<compile_context>
chip_gen: v5e
topology: v5e:2x2
jax: 0.10.0
libtpu: 0.0.40
codegen_flags: <defaults>
</compile_context>

<pallas_src>
import functools

import jax
import jax.numpy as jnp
from jax.experimental import pallas as pl
from jax.experimental.pallas import tpu as pltpu

_HIGHEST = jax.lax.Precision.HIGHEST


def _round_up(x, m):
    return ((x + m - 1) // m) * m


def _vmem_capacity_bytes():
    """Physical VMEM per TensorCore; conservative (v7x-sized) if unknown."""
    try:
        return int(pltpu.get_tpu_info().vmem_capacity_bytes)
    except Exception:
        return 64 * 1024 * 1024


# ---------------------------------------------------------------------------
# Fused single-pass kernel: whole (C, HW) slab of TN samples per grid step.
# ---------------------------------------------------------------------------
def ca_fused_kernel(hw_true, wmix_ref, x_ref, w1t_ref, w2t_ref, out_ref):
    # wmix_ref : SMEM (2,)          precomputed w / (sum(w) + 1e-4)
    # x_ref    : VMEM (TN, C, HW)   logical HW extent (Mosaic masks lane pad)
    # w1t_ref  : VMEM (C, C//r)     fc[0].weight transposed
    # w2t_ref  : VMEM (C//r, C)     fc[2].weight transposed
    # out_ref  : VMEM (TN, C, HW)
    x = x_ref[...]                                               # f32

    avg = jnp.sum(x, axis=-1) * (1.0 / float(hw_true))           # (TN, C)
    mx = jnp.max(x, axis=-1)                                     # (TN, C)
    z = wmix_ref[0] * avg + wmix_ref[1] * mx                     # (TN, C)

    h = jnp.maximum(
        jnp.dot(z, w1t_ref[...], preferred_element_type=jnp.float32,
                precision=_HIGHEST), 0.0)                        # (TN, C//r)
    y = jax.nn.sigmoid(
        jnp.dot(h, w2t_ref[...], preferred_element_type=jnp.float32,
                precision=_HIGHEST))                             # (TN, C)

    # Re-read x from VMEM for the rescale (keeps vreg pressure low).
    out_ref[...] = x_ref[...] * y[:, :, None]


# ---------------------------------------------------------------------------
# Two-pass fallback for slabs larger than the block budget.
# ---------------------------------------------------------------------------
def ca_reduce_kernel(hw_true, wmix_ref, x_ref, w1t_ref, w2t_ref, y_ref,
                     sum_acc, max_acc):
    j = pl.program_id(1)

    @pl.when(j == 0)
    def _():
        sum_acc[...] = jnp.zeros_like(sum_acc)
        max_acc[...] = jnp.full_like(max_acc, -jnp.inf)

    x = x_ref[...]                                               # (TN, C, THW)
    thw = x.shape[-1]
    lane = jax.lax.broadcasted_iota(jnp.int32, x.shape, 2)
    valid = (j * thw + lane) < hw_true                           # mask HW tail
    sum_acc[...] += jnp.sum(jnp.where(valid, x, 0.0), axis=-1)
    max_acc[...] = jnp.maximum(
        max_acc[...], jnp.max(jnp.where(valid, x, -jnp.inf), axis=-1))

    @pl.when(j == pl.num_programs(1) - 1)
    def _():
        z = (wmix_ref[0] * (sum_acc[...] * (1.0 / float(hw_true)))
             + wmix_ref[1] * max_acc[...])
        hmid = jnp.maximum(
            jnp.dot(z, w1t_ref[...], preferred_element_type=jnp.float32,
                    precision=_HIGHEST), 0.0)
        y_ref[:, 0, :] = jax.nn.sigmoid(
            jnp.dot(hmid, w2t_ref[...], preferred_element_type=jnp.float32,
                    precision=_HIGHEST))


def ca_scale_kernel(x_ref, y_ref, out_ref):
    out_ref[...] = x_ref[...] * y_ref[:, 0, :][:, :, None]


def _ca_layer_two_pass(x_flat, wmix, w1t, w2t, hw, block_budget, vmem_limit):
    n, c, _ = x_flat.shape
    hid = w1t.shape[1]
    c_pad = _round_up(c, 8)

    thw = max(128, (block_budget // (c_pad * 4)) // 128 * 128)   # lane-dense
    thw = min(thw, _round_up(hw, 128))
    tn = max(1, block_budget // (c_pad * thw * 4))
    tn = min(tn, n)
    n_steps = pl.cdiv(n, tn)
    hw_steps = pl.cdiv(hw, thw)

    # Pass 1: masked sum/max over HW tiles -> squeeze/excite MLP -> y (n,1,c).
    y = pl.pallas_call(
        functools.partial(ca_reduce_kernel, hw),
        out_shape=jax.ShapeDtypeStruct((n, 1, c), jnp.float32),
        grid_spec=pltpu.PrefetchScalarGridSpec(
            num_scalar_prefetch=0,
            grid=(n_steps, hw_steps),
            in_specs=[
                pl.BlockSpec(memory_space=pltpu.MemorySpace.SMEM),      # wmix
                pl.BlockSpec((tn, c, thw), lambda i, j: (i, 0, j)),     # x
                pl.BlockSpec((c, hid), lambda i, j: (0, 0)),            # W1^T
                pl.BlockSpec((hid, c), lambda i, j: (0, 0)),            # W2^T
            ],
            out_specs=pl.BlockSpec((tn, 1, c), lambda i, j: (i, 0, 0)),
            scratch_shapes=[pltpu.VMEM((tn, c), jnp.float32),
                            pltpu.VMEM((tn, c), jnp.float32)],
        ),
        compiler_params=pltpu.CompilerParams(
            dimension_semantics=("parallel", "arbitrary"),
            vmem_limit_bytes=vmem_limit,
        ),
    )(wmix, x_flat, w1t, w2t)

    # Pass 2: rescale x by the per-(sample, channel) gate.
    out_flat = pl.pallas_call(
        ca_scale_kernel,
        out_shape=jax.ShapeDtypeStruct((n, c, hw), jnp.float32),
        grid_spec=pltpu.PrefetchScalarGridSpec(
            num_scalar_prefetch=0,
            grid=(n_steps, hw_steps),
            in_specs=[
                pl.BlockSpec((tn, c, thw), lambda i, j: (i, 0, j)),
                pl.BlockSpec((tn, 1, c), lambda i, j: (i, 0, 0)),
            ],
            out_specs=pl.BlockSpec((tn, c, thw), lambda i, j: (i, 0, j)),
        ),
        compiler_params=pltpu.CompilerParams(
            dimension_semantics=("parallel", "parallel"),
            vmem_limit_bytes=vmem_limit,
        ),
    )(x_flat, y)
    return out_flat


# ---------------------------------------------------------------------------
# Wrapper
# ---------------------------------------------------------------------------
def ca_layer(x, w, fc1_w, fc2_w, *, max_block_bytes=None):
    """x: (S, B, C, H, W) f32.  fc1_w: (C//r, C), fc2_w: (C, C//r), w: (2,)."""
    s, b, c, h, wdim = x.shape
    n = s * b
    hw = h * wdim

    vmem_cap = _vmem_capacity_bytes()
    small_vmem = vmem_cap <= 96 * 1024 * 1024        # v7x: 64 MiB / TC, 2 TCs
    if max_block_bytes is not None:
        block_budget = int(max_block_bytes)
    elif small_vmem:
        block_budget = 4 * 1024 * 1024
    else:
        block_budget = 10 * 1024 * 1024
    vmem_limit = (30 if small_vmem else 64) * 1024 * 1024

    # Precompute the normalized mixing weights (no per-step scalar divides).
    wmix = (w / (jnp.sum(w) + 0.0001)).astype(jnp.float32)       # (2,)
    w1t = fc1_w.T                                                # (C, C//r)
    w2t = fc2_w.T                                                # (C//r, C)
    hid = w1t.shape[1]

    # Free reshape (contiguous dims) — no HBM pad, no output slice.
    x_flat = x.reshape(n, c, hw)

    # VMEM footprint of one sample's (C, HW) slab (8-sublane / 128-lane tiles).
    row_bytes = _round_up(c, 8) * _round_up(hw, 128) * 4

    if row_bytes <= block_budget:
        tn = max(1, block_budget // row_bytes)
        tn = min(tn, n)
        if small_vmem and n >= 2:
            # 2 TensorCores shard the parallel axis: keep an even step count.
            steps = max(2, pl.cdiv(n, tn))
            if steps % 2:
                steps += 1
            tn = pl.cdiv(n, steps)
        grid = (pl.cdiv(n, tn),)
        out_flat = pl.pallas_call(
            functools.partial(ca_fused_kernel, hw),
            out_shape=jax.ShapeDtypeStruct((n, c, hw), jnp.float32),
            grid_spec=pltpu.PrefetchScalarGridSpec(
                num_scalar_prefetch=0,
                grid=grid,
                in_specs=[
                    pl.BlockSpec(memory_space=pltpu.MemorySpace.SMEM),   # wmix
                    pl.BlockSpec((tn, c, hw), lambda i: (i, 0, 0)),      # x
                    pl.BlockSpec((c, hid), lambda i: (0, 0)),            # W1^T
                    pl.BlockSpec((hid, c), lambda i: (0, 0)),            # W2^T
                ],
                out_specs=pl.BlockSpec((tn, c, hw), lambda i: (i, 0, 0)),
            ),
            compiler_params=pltpu.CompilerParams(
                dimension_semantics=("parallel",),
                vmem_limit_bytes=vmem_limit,
            ),
        )(wmix, x_flat, w1t, w2t)
        return out_flat.reshape(s, b, c, h, wdim)

    # One (C, HW) slab exceeds the block budget -> two-pass over HW.
    out_flat = _ca_layer_two_pass(x_flat, wmix, w1t, w2t, hw,
                                  block_budget, vmem_limit)
    return out_flat.reshape(s, b, c, h, wdim)


# ---------------------------------------------------------------------------
# Pure-JAX reference mirroring the PyTorch forward.
# ---------------------------------------------------------------------------
def ca_layer_ref(x, w, fc1_w, fc2_w):
    s, b, c, h, wdt = x.shape
    y1 = jnp.mean(x, axis=(-2, -1))                        # (S, B, C)
    y2 = jnp.max(x.reshape(s, b, c, -1), axis=-1)          # (S, B, C)
    weight = w / (jnp.sum(w) + 0.0001)
    z = weight[0] * y1 + weight[1] * y2
    hmid = jax.nn.relu(jnp.dot(z, fc1_w.T, precision=_HIGHEST))
    y = jax.nn.sigmoid(jnp.dot(hmid, fc2_w.T, precision=_HIGHEST))
    return x * y[:, :, :, None, None]


def _run_case(key, S, B, C, H, W, reduction, max_block_bytes=None):
    hidden = max(1, C // reduction)
    kx, k1, k2 = jax.random.split(key, 3)
    x = jax.random.normal(kx, (S, B, C, H, W), dtype=jnp.float32)
    fc1_w = jax.random.normal(k1, (hidden, C), dtype=jnp.float32) * 0.1
    fc2_w = jax.random.normal(k2, (C, hidden), dtype=jnp.float32) * 0.1
    w = jnp.ones((2,), dtype=jnp.float32)      # nn.Parameter(torch.ones(2))

    out = jax.block_until_ready(
        ca_layer(x, w, fc1_w, fc2_w, max_block_bytes=max_block_bytes))
    ref = jax.block_until_ready(ca_layer_ref(x, w, fc1_w, fc2_w))
    assert out.shape == x.shape
    assert jnp.allclose(out, ref, atol=1e-5, rtol=1e-5), "mismatch vs reference"


if __name__ == "__main__":
    key = jax.random.PRNGKey(0)
    k0, k1, k2 = jax.random.split(key, 3)

    # 1) Fused path, HW a multiple of 128, auto tn sizing.
    _run_case(k0, S=2, B=2, C=64, H=16, W=16, reduction=16)

    # 2) Fused path, HW=64 (lane-unaligned, no HBM pad) with a forced partial
    #    N block (tn=2 over n=3) -> exercises masked last-block writes.
    _run_case(k1, S=1, B=3, C=32, H=8, W=8, reduction=16,
              max_block_bytes=32 * 1024)

    # 3) Two-pass fallback (one slab exceeds the block budget): HW=192 split
    #    into 128-lane tiles with a masked partial tile and sum/max carry.
    _run_case(k2, S=2, B=3, C=32, H=8, W=24, reduction=8,
              max_block_bytes=16 * 1024)

    print("KERNEL_OK")
</pallas_src>

<mosaic_0001>
module attributes {stable_mosaic.version = 11 : i64} {
  func.func @ca_fused_kernel(%arg0: i32, %arg1: memref<2xf32, #tpu.memory_space<smem>>, %arg2: memref<2x64x256xf32, #tpu.memory_space<vmem>>, %arg3: memref<64x4xf32, #tpu.memory_space<vmem>>, %arg4: memref<4x64xf32, #tpu.memory_space<vmem>>, %arg5: memref<2x64x256xf32, #tpu.memory_space<vmem>>) attributes {dimension_semantics = [#tpu.dimension_semantics<parallel>], iteration_bounds = array<i64: 2>, scalar_prefetch = 0 : i64, scratch_operands = 0 : i64, tpu.core_type = #tpu.core_type<tc>, window_params = [{transform_indices = @transform_0, window_bounds = array<i64: 2>}, {transform_indices = @transform_1, window_bounds = array<i64: 2, 64, 256>}, {pipeline_mode = #tpu.pipeline_mode<synchronous>, transform_indices = @transform_2, window_bounds = array<i64: 64, 4>}, {pipeline_mode = #tpu.pipeline_mode<synchronous>, transform_indices = @transform_3, window_bounds = array<i64: 4, 64>}, {transform_indices = @transform_4, window_bounds = array<i64: 2, 64, 256>}]} {
    %c0 = arith.constant 0 : index
    %c0_0 = arith.constant 0 : index
    %c0_1 = arith.constant 0 : index
    %0 = vector.load %arg2[%c0, %c0_0, %c0_1] : memref<2x64x256xf32, #tpu.memory_space<vmem>>, vector<2x64x256xf32>
    %cst = arith.constant dense<0.000000e+00> : vector<2x64xf32>
    %1 = vector.multi_reduction <add>, %0, %cst [2] : vector<2x64x256xf32> to vector<2x64xf32>
    %cst_2 = arith.constant 3.906250e-03 : f32
    %2 = vector.broadcast %cst_2 : f32 to vector<2x64xf32>
    %3 = arith.mulf %1, %2 : vector<2x64xf32>
    %cst_3 = arith.constant dense<0xFF800000> : vector<2x64xf32>
    %4 = vector.multi_reduction <maximumf>, %0, %cst_3 [2] : vector<2x64x256xf32> to vector<2x64xf32>
    %c0_4 = arith.constant 0 : index
    %5 = memref.load %arg1[%c0_4] : memref<2xf32, #tpu.memory_space<smem>>
    %6 = vector.broadcast %5 : f32 to vector<2x64xf32>
    %7 = arith.mulf %6, %3 : vector<2x64xf32>
    %c1 = arith.constant 1 : index
    %8 = memref.load %arg1[%c1] : memref<2xf32, #tpu.memory_space<smem>>
    %9 = vector.broadcast %8 : f32 to vector<2x64xf32>
    %10 = arith.mulf %9, %4 : vector<2x64xf32>
    %11 = arith.addf %7, %10 : vector<2x64xf32>
    %c0_5 = arith.constant 0 : index
    %c0_6 = arith.constant 0 : index
    %12 = vector.load %arg3[%c0_5, %c0_6] : memref<64x4xf32, #tpu.memory_space<vmem>>, vector<64x4xf32>
    %cst_7 = arith.constant dense<0.000000e+00> : vector<2x4xf32>
    %13 = tpu.matmul %11, %12, %cst_7 {dimension_numbers = #tpu.dot_dimension_numbers<[1], [0], [0], [1], [0, 0, 1, 1], [], []>, precision = #tpu.contract_precision<fp32>} : vector<2x64xf32>, vector<64x4xf32>, vector<2x4xf32> -> vector<2x4xf32>
    %cst_8 = arith.constant 0.000000e+00 : f32
    %14 = vector.broadcast %cst_8 : f32 to vector<2x4xf32>
    %15 = arith.maximumf %13, %14 : vector<2x4xf32>
    %c0_9 = arith.constant 0 : index
    %c0_10 = arith.constant 0 : index
    %16 = vector.load %arg4[%c0_9, %c0_10] : memref<4x64xf32, #tpu.memory_space<vmem>>, vector<4x64xf32>
    %cst_11 = arith.constant dense<0.000000e+00> : vector<2x64xf32>
    %17 = tpu.matmul %15, %16, %cst_11 {dimension_numbers = #tpu.dot_dimension_numbers<[1], [0], [0], [1], [0, 0, 1, 1], [], []>, precision = #tpu.contract_precision<fp32>} : vector<2x4xf32>, vector<4x64xf32>, vector<2x64xf32> -> vector<2x64xf32>
    %18 = arith.negf %17 : vector<2x64xf32>
    %19 = math.exp %18 : vector<2x64xf32>
    %cst_12 = arith.constant 1.000000e+00 : f32
    %20 = vector.broadcast %cst_12 : f32 to vector<2x64xf32>
    %21 = arith.addf %20, %19 : vector<2x64xf32>
    %22 = arith.divf %20, %21 : vector<2x64xf32>
    %c0_13 = arith.constant 0 : index
    %c0_14 = arith.constant 0 : index
    %c0_15 = arith.constant 0 : index
    %23 = vector.load %arg2[%c0_13, %c0_14, %c0_15] : memref<2x64x256xf32, #tpu.memory_space<vmem>>, vector<2x64x256xf32>
    %24 = vector.shape_cast %22 : vector<2x64xf32> to vector<2x64x1xf32>
    %25 = vector.broadcast %24 : vector<2x64x1xf32> to vector<2x64x256xf32>
    %26 = arith.mulf %23, %25 : vector<2x64x256xf32>
    %c0_16 = arith.constant 0 : index
    %c0_17 = arith.constant 0 : index
    %c0_18 = arith.constant 0 : index
    %27 = vector.load %arg5[%c0_16, %c0_17, %c0_18] : memref<2x64x256xf32, #tpu.memory_space<vmem>>, vector<2x64x256xf32>
    tpu.vector_store %arg5[%c0_16, %c0_17, %c0_18], %26 {strides = array<i32>} : memref<2x64x256xf32, #tpu.memory_space<vmem>>, vector<2x64x256xf32>,
    return
  }
  func.func @transform_0(%arg0: i32) -> i32 {
    %c0_i32 = arith.constant 0 : i32
    %c0_i32_0 = arith.constant 0 : i32
    return %c0_i32 : i32
  }
  func.func @transform_1(%arg0: i32) -> (i32, i32, i32) {
    %c0_i32 = arith.constant 0 : i32
    %c0_i32_0 = arith.constant 0 : i32
    %c0_i32_1 = arith.constant 0 : i32
    return %arg0, %c0_i32, %c0_i32_0 : i32, i32, i32
  }
  func.func @transform_2(%arg0: i32) -> (i32, i32) {
    %c0_i32 = arith.constant 0 : i32
    %c0_i32_0 = arith.constant 0 : i32
    %c0_i32_1 = arith.constant 0 : i32
    return %c0_i32, %c0_i32_0 : i32, i32
  }
  func.func @transform_3(%arg0: i32) -> (i32, i32) {
    %c0_i32 = arith.constant 0 : i32
    %c0_i32_0 = arith.constant 0 : i32
    %c0_i32_1 = arith.constant 0 : i32
    return %c0_i32, %c0_i32_0 : i32, i32
  }
  func.func @transform_4(%arg0: i32) -> (i32, i32, i32) {
    %c0_i32 = arith.constant 0 : i32
    %c0_i32_0 = arith.constant 0 : i32
    %c0_i32_1 = arith.constant 0 : i32
    return %arg0, %c0_i32, %c0_i32_0 : i32, i32, i32
  }
}

</mosaic_0001>

<bundles_post_ra>
// kernel: tpu_custom_call.1
= control target key start
LH: loop header
LB: loop body
LE: loop exit
PB: predicated region body
PF: predicated region fallthrough
CT: control target
= control target key end

     0   :  { %s2006_s0 = inlined_call_operand.vmem [shape: f32[2], index: 0, kind: input, shape index: {}]   ;;  %s2007_s1 = inlined_call_operand.hbm [shape: f32[4,64,256], index: 1, kind: input, shape index: {}]   ;;  %s2008_s2 = inlined_call_operand.vmem [shape: f32[64,4], index: 2, kind: input, shape index: {}]   ;;  %s2009_s3 = inlined_call_operand.vmem [shape: f32[4,64], index: 3, kind: input, shape index: {}]   ;;  %s2010_s4 = inlined_call_operand.hbm [shape: f32[4,64,256], index: 4, kind: output, shape index: {}]  }
   0x1   :  { %2026 = sst [smem:[#allocation23_spill]] %s2006_s0 }
   0x2   :  { %9 = vsyncpa [#allocation5], 0 }
   0x3   :  { %10 = vsyncpa [#allocation3], 0 }
   0x4   :  { %12 = vsyncpa [#allocation3 + $0x1], 0 }
   0x5   :  { %13 = vsyncpa [#allocation4], 0 }
   0x6   :  { %15 = vsyncpa [#allocation4 + $0x1], 0  ;;  %s1435_s15 = smov 0   ;;  %s1437_s16 = smov 0  }
   0x7   :  { %s1439_s17 = smov 0   ;;  %s1441_s18 = smov 0  }
   0x8 LB: > { %s1456_s19 = sadd.s32 4294967295, %s1403_s18   ;;  %s1182_s20 = sadd.s32 4294967294, %s1403_s18   ;;  %s1403_s18 = sphi %s1441_s18, %s2065_s18   ;;  %s1399_s17 = sphi %s1439_s17, %s2064_s17   ;;  %s1395_s16 = sphi %s1437_s16, %s2063_s16   ;;  %s1391_s15 = sphi %s1435_s15, %s2062_s15  }
   0x9   : > { %s1460_s21 = sadd.s32 1, %s1403_s18   ;;  %s49_s22 = sadd.s32 1, %s1399_s17 }
   0xa   : > { %s46_s23 = ssub.s32 %s1403_s18, %s1460_s21  ;;  %p56_p0 = scmp.ne.s32.totalorder %s1399_s17, %s1395_s16 }
   0xb   : > { %p47_p1 = scmp.eq.s32.totalorder %s46_s23, 0  ;;  %p57_p2 = scmp.eq.s32.totalorder %s1403_s18, 0 }
   0xc   : > { %p62_p3 = scmp.ne.s32.totalorder %s1395_s16, %s1391_s15  ;;  %p63_p4 = scmp.eq.s32.totalorder %s1456_s19, 0 }
   0xd   : > { %s1472_s24 = scalar_select %p47_p1, %s1399_s17, %s49_s22  }
   0xe   : > { %p1474_p5 = por %p57_p2, %p56_p0  ;;  %p1480_p6 = por %p63_p4, %p62_p3 }
   0xf   : > { %p128_p7 = scmp.eq.s32.totalorder %s1456_s19, 1  ;;  %p134_p8 = scmp.eq.s32.totalorder %s1182_s20, 1 }
  0x10   : > { %p1183_p9 = scmp.ge.s32.totalorder %s1403_s18, 1  ;;  %p141_p10 = scmp.lt.s32.totalorder %s1403_s18, 3 }
  0x11   : > { %p1487_p11 = por %p128_p7, %p56_p0  ;;  %p1491_p12 = por %p134_p8, %p62_p3 }
  0x12   : > { %p1495_p13 = pnand %p1183_p9, %p141_p10  ;;  %s2032_s0 = sld [smem:[#allocation23_spill]] }
  0x13   : > { %p1227_p2 = scmp.lt.s32.totalorder %s1403_s18, 2  ;;  %s170_s7 = sand.u32 1, %s1399_s17  }
  0x14   : > { %p1214_p1 = pneg %p1495_p13  ;;  %s1186_s9 = sshll.u32 %s170_s7, 8 }
  0x15   : > { %p1511_p3 = pnand %p1227_p2, %p1474_p5  ;;  %s1405_s10 = smov [#allocation2]  }
  0x16   : > { %p1215_p7 = pnand %p1214_p1, %p63_p4  ;;  %s1203_s11 = sshll.u32 %s1403_s18, 8 }
  0x17   : > { %s174_s12 = scalar_lea.vmem [#allocation6], %s1186_s9  ;;  %s180_s22 = scalar_lea.hbm %s2007_s1, %s1203_s11 }
  0x18   : > { %s153_s6 = sshll.u32 %s2032_s0, 4  ;;  %s183_s13 = sshll.u32 %s174_s12, 4  ;;  %s154_s6 = int_to_ptr.vmem [resolvable:$true] %s153_s6  ;;  %s184_s13 = int_to_ptr.vmem [resolvable:$true] %s183_s13 }
  0x19   : > { %1217 = dma.vmem_to_smem (!%p1215_p7), %s154_s6, 16, %s1405_s10, [#allocation5]  }
  0x1a   : > { %s181_s23 = sshll.u32 %s180_s22, 4  ;;  %s171_s30 = scalar_lea.sflag [#allocation3], %s170_s7  ;;  %s182_s23 = int_to_ptr.hbm [resolvable:$true] %s181_s23 }
  0x1b   : > { %s1303_s25 = sshra.s32 %s182_s23, 4  ;;  %p1307_p8 = pneg %p1511_p3  ;;  %s1304_s25 = int_to_ptr.hbm [resolvable:$true] %s1303_s25 }
  0x1c   : > { %s1305_s5 = scalar_lea.hbm %s1304_s25, 256  ;;  %s1310_s9 = scalar_lea.hbm %s2007_s1, 512 }
  0x1d   : > { %p1306_p5 = scmp.ne.s32.totalorder %s1304_s25, %s1305_s5  ;;  %p1311_p1 = scmp.lt.s32.totalorder %s1304_s25, %s2007_s1 }
  0x1e   : > { %p1312_p2 = scmp.lt.s32.totalorder %s1310_s9, %s1305_s5 }
  0x1f   : > { %p1308_p9 = pnand %p1307_p8, %p1306_p5 }
  0x20   : > { %p1313_p7 = por %p1312_p2, %p1311_p1 }
  0x21   : > { %p1309_p10 = pneg %p1308_p9 }
  0x23   : > { %p1314_p0 = pnand %p1313_p7, %p1309_p10 }
  0x25   : > { %1317 = shalt.err (!%p1314_p0)
}
  0x26   : > { %s1406_s7 = smov 256   ;;  %s1407_s11 = smov 16  }
  0x27   : > { %1221 = dma.hbm_to_vmem [thread:$0]  (!%p1511_p3), %s182_s23, 4096, %s184_s13, %s171_s30, %s1406_s7, %s1406_s7, %s1407_s11  }
  0x28   : > { %195 = sbr.rel (%p1495_p13) target bundleno = 803 (0x323), region = 36 }
  0x2d   : > { %1378 = dma.done.wait (%p63_p4), [#allocation5], 16  }
  0x2e   : > { %1380 = vsyncadd (%p63_p4), [#allocation5], 4294967280  ;;  %s1536_s0 = sand.u32 1, %s1395_s16  }
  0x2f   : > { %s1192_s14 = sshll.u32 %s1536_s0, 8  ;;  %s203_s20 = scalar_lea.sflag [#allocation3], %s1536_s0 }
  0x30   : > { %s1542_s8 = scalar_lea.vmem [#allocation6], %s1192_s14 }
  0x31   : > { %1382 = dma.done.wait (%p1480_p6), %s203_s20, 4096  }
  0x32   : > { %1384 = vsyncadd (%p1480_p6), %s203_s20, 4294963200 }
  0x33   : > { %212 = sfence }
  0x34   : > { %v1549_v0 = vld [vmem:[%s1542_s8 + $0x80] sm:$0xff]  ;;  %v1552_v1 = vld [vmem:[%s1542_s8 + $0x88] sm:$0xff]  ;;  %v1573_v9 = vld [vmem:[%s1542_s8 + $0x90] sm:$0xff]  ;;  %s1194_s26 = sld [smem:[#allocation2 + $0x1]]  ;;  %vm460_vm0 = vcmask 130112   ;;  %vm464_vm1 = vcmask 195712  }
  0x35   : > { %v1555_v2 = vld [vmem:[%s1542_s8 + $0x20] sm:$0xff]  ;;  %v291_v3 = vadd.f32 %v1552_v1, %v1549_v0  ;;  %v1560_v4 = vld [vmem:[%s1542_s8 + $0x28] sm:$0xff]  ;;  %2034 = vst [vmem:[#allocation11_spill] sm:$0xff] %v1573_v9  ;;  %v1576_v10 = vld [vmem:[%s1542_s8 + $0x98] sm:$0xff]  ;;  %v355_v25 = vmax.f32 %v1549_v0, %v1552_v1  ;;  %s379_s29 = sld [smem:[#allocation2]]  ;;  %vm468_vm2 = vcmask 261312  }
  0x36   : > { %v1563_v5 = vld [vmem:[%s1542_s8] sm:$0xff]  ;;  %v1566_v6 = vld [vmem:[%s1542_s8 + $0x8] sm:$0xff]  ;;  %v273_v7 = vadd.f32 %v1560_v4, %v1555_v2  ;;  %2035 = vst [vmem:[#allocation12_spill] sm:$0xff] %v1576_v10  ;;  %v1585_v13 = vld [vmem:[%s1542_s8 + $0x10] sm:$0xff]  ;;  %v294_v15 = vadd.f32 %v1576_v10, %v1573_v9  ;;  %v358_v26 = vmax.f32 %v1573_v9, %v1576_v10  ;;  %v337_v33 = vmax.f32 %v1555_v2, %v1560_v4  ;;  %s1908_s23 = scalar_lea.vmem [#allocation7], %s1192_s14  ;;  %s1205_s14 = sshll.u32 %s1456_s19, 8 }
  0x37   : > { %v267_v8 = vadd.f32 %v1566_v6, %v1563_v5  ;;  %292 = vadd.xlane.f32.xlu1 %v291_v3  ;;  %v1579_v11 = vld [vmem:[%s1542_s8 + $0xa0] sm:$0xff]  ;;  %v1582_v12 = vld [vmem:[%s1542_s8 + $0xa8] sm:$0xff]  ;;  %v1588_v14 = vld [vmem:[%s1542_s8 + $0x18] sm:$0xff]  ;;  %v331_v23 = vmax.f32 %v1563_v5, %v1566_v6  ;;  %vm472_vm3 = vcmask 326912   ;;  %vm476_vm4 = vcmask 392512   ;;  %s1093_s5 = scalar_lea.hbm %s2010_s4, %s1205_s14  ;;  %s1094_s6 = sshll.u32 %s1908_s23, 4  ;;  %s1095_s6 = int_to_ptr.vmem [resolvable:$true] %s1094_s6 }
  0x38   : > { %274 = vadd.xlane.f32.xlu2 %v273_v7  ;;  %2036 = vst [vmem:[#allocation13_spill] sm:$0xff] %v1579_v11  ;;  %v297_v16 = vadd.f32 %v1582_v12, %v1579_v11  ;;  %v270_v17 = vadd.f32 %v1588_v14, %v1585_v13  ;;  %v1597_v18 = vld [vmem:[%s1542_s8 + $0xb0] sm:$0xff]  ;;  %v1600_v19 = vld [vmem:[%s1542_s8 + $0xb8] sm:$0xff]  ;;  %v334_v27 = vmax.f32 %v1585_v13, %v1588_v14  ;;  %v1621_v28 = vld [vmem:[%s1542_s8 + $0xc0] sm:$0xff]  ;;  %vm480_vm5 = vcmask 458112   ;;  %s1096_s10 = sshll.u32 %s1093_s5, 4  ;;  %s1097_s10 = int_to_ptr.hbm [resolvable:$true] %s1096_s10 }
  0x39   : > { %268 = vadd.xlane.f32.xlu0 %v267_v8  ;;  %2037 = vst [vmem:[#allocation14_spill] sm:$0xff] %v1582_v12  ;;  %v1603_v20 = vld [vmem:[%s1542_s8 + $0x30] sm:$0xff]  ;;  %v1606_v21 = vld [vmem:[%s1542_s8 + $0x38] sm:$0xff]  ;;  %v300_v22 = vadd.f32 %v1600_v19, %v1597_v18  ;;  %v1624_v29 = vld [vmem:[%s1542_s8 + $0xc8] sm:$0xff]  ;;  %v361_v41 = vmax.f32 %v1579_v11, %v1582_v12  ;;  %v364_v44 = vmax.f32 %v1597_v18, %v1600_v19  ;;  %vm484_vm6 = vcmask 523712   ;;  %s1081_s19 = scalar_lea.sflag [#allocation4], %s1536_s0 }
  0x3a   : > { %2038 = vst [vmem:[#allocation15_spill] sm:$0xff] %v1597_v18  ;;  %v276_v24 = vadd.f32 %v1606_v21, %v1603_v20  ;;  %v1627_v30 = vld [vmem:[%s1542_s8 + $0x40] sm:$0xff]  ;;  %v1630_v31 = vld [vmem:[%s1542_s8 + $0x48] sm:$0xff]  ;;  %v303_v32 = vadd.f32 %v1624_v29, %v1621_v28  ;;  %v1639_v35 = vld [vmem:[%s1542_s8 + $0x50] sm:$0xff]  ;;  %v340_v46 = vmax.f32 %v1603_v20, %v1606_v21  ;;  %v367_v50 = vmax.f32 %v1621_v28, %v1624_v29  ;;  %s1347_s9 = sshra.s32 %s1097_s10, 4  ;;  %s1353_s20 = scalar_lea.hbm %s2010_s4, 512  ;;  %s1348_s9 = int_to_ptr.hbm [resolvable:$true] %s1347_s9 }
  0x3b   : > { %2039 = vst [vmem:[#allocation16_spill] sm:$0xff] %v1600_v19  ;;  %v279_v34 = vadd.f32 %v1630_v31, %v1627_v30  ;;  %v1642_v36 = vld [vmem:[%s1542_s8 + $0x58] sm:$0xff]  ;;  %v1645_v37 = vld [vmem:[%s1542_s8 + $0xd0] sm:$0xff]  ;;  %v1657_v42 = vld [vmem:[%s1542_s8 + $0x60] sm:$0xff]  ;;  %v343_v49 = vmax.f32 %v1627_v30, %v1630_v31  ;;  %vm501_vm7 = vcmask 1041409   ;;  %vm503_vm8 = vcmask 523264   ;;  %p1354_p0 = scmp.lt.s32.totalorder %s1348_s9, %s2010_s4 }
  0x3c   : > { %2040 = vst [vmem:[#allocation17_spill] sm:$0xff] %v1621_v28  ;;  %v1648_v38 = vld [vmem:[%s1542_s8 + $0xd8] sm:$0xff]  ;;  %v282_v39 = vadd.f32 %v1642_v36, %v1639_v35  ;;  %v1660_v43 = vld [vmem:[%s1542_s8 + $0x68] sm:$0xff]  ;;  %v1669_v47 = vld [vmem:[%s1542_s8 + $0xe0] sm:$0xff]  ;;  %v346_v57 = vmax.f32 %v1639_v35, %v1642_v36  ;;  %vm749_vm9 = vcmask 1043456   ;;  %vm745_vm10 = vcmask 31744  }
  0x3d   : > { %2041 = vst [vmem:[#allocation18_spill] sm:$0xff] %v1624_v29  ;;  %v306_v40 = vadd.f32 %v1648_v38, %v1645_v37  ;;  %v285_v45 = vadd.f32 %v1660_v43, %v1657_v42  ;;  %v1672_v48 = vld [vmem:[%s1542_s8 + $0xe8] sm:$0xff]  ;;  %v1681_v52 = vld [vmem:[%s1542_s8 + $0xf0] sm:$0xff]  ;;  %v1684_v53 = vld [vmem:[%s1542_s8 + $0xf8] sm:$0xff]  ;;  %v349_v59 = vmax.f32 %v1657_v42, %v1660_v43  ;;  %v370_v61 = vmax.f32 %v1645_v37, %v1648_v38  ;;  %s1349_s12 = scalar_lea.hbm %s1348_s9, 256 }
  0x3e   : > { %2042 = vst [vmem:[#allocation19_spill] sm:$0xff] %v1669_v47  ;;  %v309_v51 = vadd.f32 %v1672_v48, %v1669_v47  ;;  %v1687_v54 = vld [vmem:[%s1542_s8 + $0x70] sm:$0xff]  ;;  %v1690_v55 = vld [vmem:[%s1542_s8 + $0x78] sm:$0xff]  ;;  %v312_v56 = vadd.f32 %v1684_v53, %v1681_v52  ;;  %v373_v60 = vmax.f32 %v1669_v47, %v1672_v48  ;;  %v376_v62 = vmax.f32 %v1681_v52, %v1684_v53  ;;  %p1350_p4 = scmp.ne.s32.totalorder %s1348_s9, %s1349_s12  ;;  %p1355_p3 = scmp.lt.s32.totalorder %s1353_s20, %s1349_s12 }
  0x3f   : > { %295 = vadd.xlane.f32.xlu1 %v294_v15  ;;  %2043 = vst [vmem:[#allocation20_spill] sm:$0xff] %v1672_v48  ;;  %v288_v58 = vadd.f32 %v1690_v55, %v1687_v54  ;;  %v352_v63 = vmax.f32 %v1687_v54, %v1690_v55 }
  0x40   : > { %298 = vadd.xlane.f32.xlu2 %v297_v16  ;;  %2044 = vst [vmem:[#allocation21_spill] sm:$0xff] %v1681_v52  ;;  %p1351_p6 = pnand %p1350_p4, %p1487_p11  ;;  %p1356_p5 = por %p1355_p3, %p1354_p0 }
  0x41   : > { %271 = vadd.xlane.f32.xlu0 %v270_v17  ;;  %2045 = vst [vmem:[#allocation22_spill] sm:$0xff] %v1684_v53  ;;  %v432_v53 = vld [vmem:[%s2008_s2 + $0x8] sm:$0xff] }
  0x42   : > { %p1352_p13 = pneg %p1351_p6 }
  0x44   : > { %p1357_p8 = pnand %p1356_p5, %p1352_p13 }
  0x47   : > { %301 = vadd.xlane.f32.xlu1 %v300_v22 }
  0x48   : > { %332 = vmax.xlane.f32.xlu2 %v331_v23 }
  0x49   : > { %277 = vadd.xlane.f32.xlu0 %v276_v24 }
  0x4f   : > { %356 = vmax.xlane.f32.xlu1 %v355_v25  ;;  %v1714_v25 = vstv %s1194_s26 }
  0x50   : > { %359 = vmax.xlane.f32.xlu2 %v358_v26  ;;  %v2011_v26 = vlaneseq }
  0x51   : > { %335 = vmax.xlane.f32.xlu0 %v334_v27 }
  0x57   : > { %304 = vadd.xlane.f32.xlu1 %v303_v32  ;;  %v1716_v32 = vstv %s379_s29 }
  0x58   : > { %338 = vmax.xlane.f32.xlu2 %v337_v33 }
  0x59   : > { %280 = vadd.xlane.f32.xlu0 %v279_v34 }
  0x5f   : > { %283 = vadd.xlane.f32.xlu1 %v282_v39 }
  0x60   : > { %307 = vadd.xlane.f32.xlu2 %v306_v40 }
  0x61   : > { %362 = vmax.xlane.f32.xlu0 %v361_v41  ;;  %v1720_v41 = vand.u32 127, %v2011_v26 }
  0x67   : > { %365 = vmax.xlane.f32.xlu1 %v364_v44 }
  0x68   : > { %286 = vadd.xlane.f32.xlu2 %v285_v45 }
  0x69   : > { %341 = vmax.xlane.f32.xlu0 %v340_v46 }
  0x6f   : > { %344 = vmax.xlane.f32.xlu1 %v343_v49 }
  0x70   : > { %368 = vmax.xlane.f32.xlu2 %v367_v50 }
  0x71   : > { %310 = vadd.xlane.f32.xlu0 %v309_v51  ;;  %v458_v51 = vadd.s32 4294967288, %v1720_v41 }
  0x77   : > { %313 = vadd.xlane.f32.xlu1 %v312_v56 }
  0x78   : > { %347 = vmax.xlane.f32.xlu2 %v346_v57 }
  0x79   : > { %289 = vadd.xlane.f32.xlu0 %v288_v58 }
  0x7f   : > { %350 = vmax.xlane.f32.xlu1 %v349_v59 }
  0x80   : > { %374 = vmax.xlane.f32.xlu2 %v373_v60 }
  0x81   : > { %371 = vmax.xlane.f32.xlu0 %v370_v61 }
  0x87   : > { %377 = vmax.xlane.f32.xlu1 %v376_v62 }
  0x89   : > { %353 = vmax.xlane.f32.xlu0 %v352_v63 }
  0xaa   : > { %v293_v3 = vpop.xlane.xlu1 %292 }
  0xab   : > { %v275_v7 = vpop.xlane.xlu2 %274  ;;  %v323_v33 = vmul.f32 0.00390625, %v293_v3 }
  0xac   : > { %v269_v8 = vpop.xlane.xlu0 %268 }
  0xad   : > { %v315_v27 = vmul.f32 0.00390625, %v269_v8  ;;  %v389_v46 = vmul.f32 %v1716_v32, %v323_v33  ;;  %v438_v8 = vld [vmem:[%s2008_s2 + $0x38] sm:$0xff] }
  0xaf   : > { %v381_v44 = vmul.f32 %v1716_v32, %v315_v27 }
  0xb2   : > { %v296_v15 = vpop.xlane.xlu1 %295 }
  0xb3   : > { %v1708_v16 = vpop.xlane.xlu2 %298  ;;  %v324_v34 = vmul.f32 0.00390625, %v296_v15 }
  0xb4   : > { %v272_v17 = vpop.xlane.xlu0 %271 }
  0xb5   : > { %v316_v39 = vmul.f32 0.00390625, %v272_v17  ;;  %v390_v49 = vmul.f32 %v1716_v32, %v324_v34  ;;  %v1734_v17 = vand.u32 4294901760, %v438_v8 }
  0xb7   : > { %v382_v58 = vmul.f32 %v1716_v32, %v316_v39  ;;  %v437_v39 = vld [vmem:[%s2008_s2 + $0x30] sm:$0xff]  ;;  %515 = vmatpush.msra.mxu0 %v1734_v17  ;;  %647 = vmatpush.msra.mxu3 %v1734_v17 }
  0xba   : > { %v1710_v22 = vpop.xlane.xlu1 %301 }
  0xbb   : > { %v333_v23 = vpop.xlane.xlu2 %332 }
  0xbc   : > { %v1712_v24 = vpop.xlane.xlu0 %277  ;;  %v399_v40 = vmul.f32 %v1714_v25, %v333_v23  ;;  %v317_v23 = vmul.f32 0.00390625, %v275_v7 }
  0xbe   : > { %v415_v59 = vadd.f32 %v399_v40, %v381_v44  ;;  %v1741_v40 = vsub.f32 %v438_v8, %v1734_v17  ;;  %v1743_v44 = vand.u32 4294901760, %v437_v39 }
  0xc0   : > { %v457_v27 = vperm.slane %v415_v59, %v1720_v41  ;;  %610 = vmatpush.msra.mxu2 %v1741_v40  ;;  %517 = vmatpush.msra.mxu0 %v1743_v44  ;;  %v383_v59 = vmul.f32 %v1716_v32, %v317_v23  ;;  %v434_v23 = vld [vmem:[%s2008_s2 + $0x18] sm:$0xff] }
  0xc1   : > { %649 = vmatpush.msra.mxu3 %v1743_v44 }
  0xc2   : > { %v357_v45 = vpop.xlane.xlu1 %356 }
  0xc3   : > { %v407_v50 = vmul.f32 %v1714_v25, %v357_v45  ;;  %v360_v56 = vpop.xlane.xlu2 %359 }
  0xc4   : > { %v336_v57 = vpop.xlane.xlu0 %335  ;;  %v408_v60 = vmul.f32 %v1714_v25, %v360_v56  ;;  %v2013_v56 = vand.u32 4294901760, %v1741_v40 }
  0xc5   : > { %v400_v61 = vmul.f32 %v1714_v25, %v336_v57  ;;  %v423_v62 = vadd.f32 %v407_v50, %v389_v46  ;;  %v1758_v57 = vsub.f32 %v437_v39, %v1743_v44 }
  0xc6   : > { %v424_v63 = vadd.f32 %v408_v60, %v390_v49  ;;  %v436_v49 = vld [vmem:[%s2008_s2 + $0x28] sm:$0xff]  ;;  %v1766_v60 = vadd.s32 4294967280, %v1720_v41 }
  0xc7   : > { %v416_v3 = vadd.f32 %v400_v61, %v382_v58  ;;  %v486_v15 = vperm.slane %v423_v62, %v1720_v41  ;;  %v1760_v58 = vand.u32 4294901760, %v436_v49  ;;  %v435_v62 = vld [vmem:[%s2008_s2 + $0x20] sm:$0xff]  ;;  %613 = vmatpush.msra.mxu2 %v1758_v57  ;;  %v2012_v8 = vand.u32 4294901760, %v1758_v57 }
  0xc8   : > { %v487_v33 = vperm.slane %v424_v63, %v458_v51  ;;  %v550_v63 = vsub.f32 %v1741_v40, %v2013_v56 }
  0xc9   : > { %v459_v34 = vperm.slane %v416_v3, %v458_v51  ;;  %519 = vmatpush.msra.mxu0 %v1760_v58  ;;  %651 = vmatpush.msra.mxu3 %v1760_v58 }
  0xca   : > { %v1747_v45 = vsel %vm460_vm0, %v487_v33, %v486_v15  ;;  %v1749_v46 = vpop.xlane.xlu1 %304  ;;  %v1780_v15 = vsub.f32 %v436_v49, %v1760_v58  ;;  %v1786_v33 = vand.u32 4294901760, %v435_v62 }
  0xcb   : > { %v461_v7 = vsel %vm460_vm0, %v459_v34, %v457_v27  ;;  %v339_v50 = vpop.xlane.xlu2 %338  ;;  %v551_v27 = vand.u32 4294901760, %v550_v63  ;;  %v1788_v34 = vand.u32 4294901760, %v434_v23 }
  0xcc   : > { %v1754_v51 = vpop.xlane.xlu0 %280  ;;  %v401_v61 = vmul.f32 %v1714_v25, %v339_v50  ;;  %v556_v50 = vsub.f32 %v1758_v57, %v2012_v8  ;;  %v561_v49 = vand.u32 4294901760, %v1780_v15  ;;  %616 = vmatpush.msra.mxu2 %v1780_v15  ;;  %521 = vmatpush.msra.mxu0 %v1786_v33 }
  0xcd   : > { %552 = vmatpush.msra.mxu1 %v551_v27  ;;  %v1801_v63 = vsub.f32 %v434_v23, %v1788_v34  ;;  %653 = vmatpush.msra.mxu3 %v1786_v33 }
  0xce   : > { %v417_v3 = vadd.f32 %v401_v61, %v383_v59  ;;  %v433_v59 = vld [vmem:[%s2008_s2 + $0x10] sm:$0xff]  ;;  %v566_v61 = vsub.f32 %v435_v62, %v1786_v33  ;;  %v557_v56 = vand.u32 4294901760, %v556_v50  ;;  %v562_v27 = vsub.f32 %v1780_v15, %v561_v49  ;;  %523 = vmatpush.msra.mxu0 %v1788_v34  ;;  %v431_v50 = vld [vmem:[%s2008_s2] sm:$0xff] }
  0xcf   : > { %v1803_v26 = vand.u32 4294901760, %v433_v59  ;;  %v573_v48 = vand.u32 4294901760, %v1801_v63  ;;  %655 = vmatpush.msra.mxu3 %v1788_v34  ;;  %v528_v18 = vand.u32 4294901760, %v431_v50 }
  0xd0   : > { %v463_v39 = vperm.slane %v417_v3, %v1766_v60  ;;  %v567_v52 = vand.u32 4294901760, %v566_v61  ;;  %619 = vmatpush.msra.mxu2 %v566_v61  ;;  %558 = vmatpush.msra.mxu1 %v557_v56  ;;  %v563_v47 = vand.u32 4294901760, %v562_v27 }
  0xd1   : > { %v574_v15 = vsub.f32 %v1801_v63, %v573_v48  ;;  %525 = vmatpush.msra.mxu0 %v1803_v26  ;;  %657 = vmatpush.msra.mxu3 %v1803_v26 }
  0xd2   : > { %v1807_v3 = vsel %vm464_vm1, %v463_v39, %v461_v7  ;;  %v1809_v8 = vpop.xlane.xlu1 %283  ;;  %v578_v7 = vsub.f32 %v433_v59, %v1803_v26  ;;  %v1823_v39 = vand.u32 4294901760, %v432_v53  ;;  %v568_v29 = vsub.f32 %v566_v61, %v567_v52  ;;  %622 = vmatpush.msra.mxu2 %v1801_v63  ;;  %564 = vmatpush.msra.mxu1 %v563_v47 }
  0xd3   : > { %v1815_v62 = vpop.xlane.xlu2 %307  ;;  %v575_v19 = vand.u32 4294901760, %v574_v15  ;;  %v590_v61 = vsub.f32 %v431_v50, %v528_v18 }
  0xd4   : > { %v1817_v23 = vpop.xlane.xlu0 %362  ;;  %v579_v28 = vand.u32 4294901760, %v578_v7  ;;  %v584_v56 = vsub.f32 %v432_v53, %v1823_v39  ;;  %v569_v59 = vand.u32 4294901760, %v568_v29  ;;  %625 = vmatpush.msra.mxu2 %v578_v7  ;;  %527 = vmatpush.msra.mxu0 %v1823_v39 }
  0xd5   : > { %659 = vmatpush.msra.mxu3 %v1823_v39  ;;  %v591_v47 = vand.u32 4294901760, %v590_v61 }
  0xd6   : > { %v580_v12 = vsub.f32 %v578_v7, %v579_v28  ;;  %v585_v11 = vand.u32 4294901760, %v584_v56  ;;  %570 = vmatpush.msra.mxu1 %v569_v59  ;;  %628 = vmatpush.msra.mxu2 %v584_v56  ;;  %v2046_v7 = vand.u32 4294901760, %v1741_v40  ;;  %v2047_v59 = vand.u32 4294901760, %v1758_v57 }
  0xd7   : > { %529 = vmatpush.msra.mxu0 %v528_v18  ;;  %661 = vmatpush.msra.mxu3 %v528_v18  ;;  %v592_v9 = vsub.f32 %v590_v61, %v591_v47 }
  0xd8   : > { %v581_v27 = vand.u32 4294901760, %v580_v12  ;;  %576 = vmatpush.msra.mxu1 %v575_v19  ;;  %v586_v29 = vsub.f32 %v584_v56, %v585_v11  ;;  %631 = vmatpush.msra.mxu2 %v590_v61 }
  0xd9   : > { %680 = vmatpush.msrb.mxu0 %v2046_v7  ;;  %v593_v50 = vand.u32 4294901760, %v592_v9  ;;  %v325_v9 = vmul.f32 0.00390625, %v1708_v16  ;;  %v1856_v16 = vadd.s32 4294967272, %v1720_v41 }
  0xda   : > { %v366_v63 = vpop.xlane.xlu1 %365  ;;  %582 = vmatpush.msra.mxu1 %v581_v27  ;;  %v587_v15 = vand.u32 4294901760, %v586_v29 }
  0xdb   : > { %v287_v53 = vpop.xlane.xlu2 %286  ;;  %684 = vmatpush.msrb.mxu0 %v2047_v59 }
  0xdc   : > { %v342_v10 = vpop.xlane.xlu0 %341  ;;  %588 = vmatpush.msra.mxu1 %v587_v15  ;;  %v474_v15 = vadd.s32 4294967256, %v1720_v41 }
  0xdd   : > { %688 = vmatpush.msrb.mxu0 %v561_v49  ;;  %v318_v49 = vmul.f32 0.00390625, %v1712_v24 }
  0xde   : > { %594 = vmatpush.msra.mxu1 %v593_v50 }
  0xdf   : > { %692 = vmatpush.msrb.mxu0 %v567_v52  ;;  %v326_v52 = vmul.f32 0.00390625, %v1710_v22 }
  0xe0   : > { %723 = vmatpush.msrb.mxu1 %v1734_v17 }
  0xe1   : > { %696 = vmatpush.msrb.mxu0 %v573_v48  ;;  %v327_v48 = vmul.f32 0.00390625, %v1749_v46  ;;  %v392_v24 = vmul.f32 %v1716_v32, %v326_v52  ;;  %v328_v46 = vmul.f32 0.00390625, %v1815_v62 }
  0xe2   : > { %v345_v12 = vpop.xlane.xlu1 %344  ;;  %725 = vmatpush.msrb.mxu1 %v1743_v44  ;;  %v391_v44 = vmul.f32 %v1716_v32, %v325_v9 }
  0xe3   : > { %v369_v19 = vpop.xlane.xlu2 %368  ;;  %700 = vmatpush.msrb.mxu0 %v579_v28  ;;  %v409_v28 = vmul.f32 %v1714_v25, %v1817_v23  ;;  %v320_v23 = vmul.f32 0.00390625, %v1809_v8  ;;  %v403_v62 = vmul.f32 %v1714_v25, %v345_v12  ;;  %v394_v50 = vmul.f32 %v1716_v32, %v328_v46 }
  0xe4   : > { %v311_v56 = vpop.xlane.xlu0 %310  ;;  %727 = vmatpush.msrb.mxu1 %v1760_v58  ;;  %v411_v22 = vmul.f32 %v1714_v25, %v369_v19  ;;  %v1863_v58 = vadd.s32 4294967264, %v1720_v41  ;;  %v478_v46 = vadd.s32 4294967248, %v1720_v41 }
  0xe5   : > { %704 = vmatpush.msrb.mxu0 %v585_v11  ;;  %v410_v11 = vmul.f32 %v1714_v25, %v366_v63  ;;  %v402_v63 = vmul.f32 %v1714_v25, %v342_v10  ;;  %v329_v27 = vmul.f32 0.00390625, %v311_v56  ;;  %v386_v56 = vmul.f32 %v1716_v32, %v320_v23 }
  0xe6   : > { %729 = vmatpush.msrb.mxu1 %v1786_v33  ;;  %v393_v33 = vmul.f32 %v1716_v32, %v327_v48 }
  0xe7   : > { %708 = vmatpush.msrb.mxu0 %v591_v47  ;;  %v426_v61 = vadd.f32 %v410_v11, %v392_v24  ;;  %v321_v47 = vmul.f32 0.00390625, %v287_v53 }
  0xe8   : > { %731 = vmatpush.msrb.mxu1 %v1788_v34  ;;  %v319_v34 = vmul.f32 0.00390625, %v1754_v51  ;;  %v427_v7 = vadd.f32 %v411_v22, %v393_v33 }
  0xe9   : > { %v491_v9 = vperm.slane %v426_v61, %v1856_v16  ;;  %v482_v61 = vadd.s32 4294967240, %v1720_v41 }
  0xea   : > { %v314_v40 = vpop.xlane.xlu1 %313  ;;  %733 = vmatpush.msrb.mxu1 %v1803_v26  ;;  %v384_v26 = vmul.f32 %v1716_v32, %v318_v49  ;;  %v385_v10 = vmul.f32 %v1716_v32, %v319_v34  ;;  %v395_v49 = vmul.f32 %v1716_v32, %v329_v27  ;;  %v493_v11 = vperm.slane %v427_v7, %v1863_v58 }
  0xeb   : > { %v348_v57 = vpop.xlane.xlu2 %347 }
  0xec   : > { %v290_v17 = vpop.xlane.xlu0 %289  ;;  %735 = vmatpush.msrb.mxu1 %v1823_v39  ;;  %v425_v39 = vadd.f32 %v409_v28, %v391_v44  ;;  %v404_v51 = vmul.f32 %v1714_v25, %v348_v57  ;;  %v418_v52 = vadd.f32 %v402_v63, %v384_v26  ;;  %v387_v57 = vmul.f32 %v1716_v32, %v321_v47 }
  0xed   : > { %v419_v28 = vadd.f32 %v403_v62, %v385_v10  ;;  %v330_v44 = vmul.f32 0.00390625, %v314_v40  ;;  %v322_v24 = vmul.f32 0.00390625, %v290_v17 }
  0xee   : > { %737 = vmatpush.msrb.mxu1 %v528_v18  ;;  %v489_v53 = vperm.slane %v425_v39, %v1766_v60  ;;  %v420_v22 = vadd.f32 %v404_v51, %v386_v56  ;;  %v467_v39 = vperm.slane %v418_v52, %v1856_v16 }
  0xef   : > { %v471_v40 = vperm.slane %v419_v28, %v1863_v58  ;;  %v396_v27 = vmul.f32 %v1716_v32, %v330_v44  ;;  %v388_v62 = vmul.f32 %v1716_v32, %v322_v24 }
  0xf0   : > { %v490_v60 = vsel %vm464_vm1, %v489_v53, %v1747_v45  ;;  %v475_v45 = vperm.slane %v420_v22, %v474_v15  ;;  %v469_v58 = vsel %vm468_vm2, %v467_v39, %v1807_v3 }
  0xf1   : > { %v492_v26 = vsel %vm468_vm2, %v491_v9, %v490_v60  ;;  %v473_v51 = vsel %vm472_vm3, %v471_v40, %v469_v58  ;;  %v2048_v58 = vlaneseq }
  0xf2   : > { %v351_v29 = vpop.xlane.xlu1 %350  ;;  %v494_v17 = vsel %vm472_vm3, %v493_v11, %v492_v26 }
  0xf3   : > { %v375_v18 = vpop.xlane.xlu2 %374  ;;  %v405_v12 = vmul.f32 %v1714_v25, %v351_v29 }
  0xf4   : > { %v372_v59 = vpop.xlane.xlu0 %371  ;;  %v413_v8 = vmul.f32 %v1714_v25, %v375_v18 }
  0xf5   : > { %v412_v19 = vmul.f32 %v1714_v25, %v372_v59  ;;  %v421_v34 = vadd.f32 %v405_v12, %v387_v57  ;;  %v744_v57 = vld [vmem:[%s2009_s3] sm:$0xf] }
  0xf6   : > { %v429_v33 = vadd.f32 %v413_v8, %v395_v49  ;;  %v751_v28 = vsel %vm749_vm9, %v744_v57, 0 }
  0xf7   : > { %v428_v48 = vadd.f32 %v412_v19, %v394_v50  ;;  %v479_v16 = vperm.slane %v421_v34, %v478_v46  ;;  %v768_v11 = vand.u32 4294901760, %v751_v28 }
  0xf8   : > { %v497_v7 = vperm.slane %v429_v33, %v478_v46 }
  0xf9   : > { %v495_v23 = vperm.slane %v428_v48, %v474_v15  ;;  %v477_v15 = vsel %vm476_vm4, %v475_v45, %v473_v51  ;;  %v795_v44 = vsub.f32 %v751_v28, %v768_v11  ;;  %769 = vmatpush.msrb.mxu2 %v768_v11 }
  0xfa   : > { %v378_v63 = vpop.xlane.xlu1 %377  ;;  %v481_v10 = vsel %vm480_vm5, %v479_v16, %v477_v15 }
  0xfb   : > { %v414_v29 = vmul.f32 %v1714_v25, %v378_v63  ;;  %v496_v41 = vsel %vm476_vm4, %v495_v23, %v494_v17  ;;  %v796_v22 = vand.u32 4294901760, %v795_v44 }
  0xfc   : > { %v354_v47 = vpop.xlane.xlu0 %353  ;;  %v498_v19 = vsel %vm480_vm5, %v497_v7, %v496_v41 }
  0xfd   : > { %v406_v18 = vmul.f32 %v1714_v25, %v354_v47  ;;  %v430_v59 = vadd.f32 %v414_v29, %v396_v27  ;;  %v797_v24 = vsub.f32 %v795_v44, %v796_v22 }
  0xff   : > { %v422_v50 = vadd.f32 %v406_v18, %v388_v62  ;;  %v499_v8 = vperm.slane %v430_v59, %v482_v61  ;;  %v798_v46 = vand.u32 4294901760, %v797_v24 }
 0x101   : > { %v483_v32 = vperm.slane %v422_v50, %v482_v61  ;;  %v500_v25 = vsel %vm484_vm6, %v499_v8, %v498_v19  ;;  %799 = vmatpush.msrb.mxu3 %v798_v46  ;;  %v920_v50 = vshrl.u32 %v2048_v58, 7 }
 0x103   : > { %v485_v56 = vsel %vm484_vm6, %v483_v32, %v481_v10  ;;  %1267 = vset.pattern.permute.xlu2 %v920_v50  ;;  %v933_v51 = vadd.s32 16, %v920_v50  ;;  %v927_v8 = vadd.s32 8, %v920_v50 }
 0x104   : > { %v502_v53 = vsel %vm501_vm7, %v500_v25, %v485_v56 }
 0x105   : > { %v504_v12 = vsel %vm503_vm8, %v502_v53, 0  ;;  %1269 = vset.pattern.permute.xlu1 %v933_v51  ;;  %1268 = vset.pattern.permute.xlu0 %v927_v8 }
 0x106   : > { %v530_v9 = vand.u32 4294901760, %v504_v12 }
 0x108   : > { %596 = vmatmul.f32.vlgmr.msra.gmra.mxu1 %v530_v9  ;;  %v531_v52 = vsub.f32 %v504_v12, %v530_v9 }
 0x109   : > { %893 = vmatpush.msra.mxu1 %v768_v11 }
 0x10a   : > { %634 = vmatmul.f32.vlgmr.msra.gmra.mxu2 %v531_v52  ;;  %v532_v3 = vand.u32 4294901760, %v531_v52 }
 0x10b   : > { %822 = vmatpush.msra.mxu2 %v795_v44 }
 0x10c   : > { %665 = vmatmul.f32.vlgmr.msra.gmra.mxu3 %v532_v3  ;;  %v533_v49 = vsub.f32 %v531_v52, %v532_v3 }
 0x10d   : > { %845 = vmatpush.msra.mxu3 %v768_v11 }
 0x10e   : > { %v534_v48 = vand.u32 4294901760, %v533_v49 }
 0x110   : > { %535 = vmatmul.f32.vlgmr.msra.gmra.mxu0 %v534_v48  ;;  %739 = vmatmul.f32.vlgmr.msrb.gmra.mxu1 %v530_v9 }
 0x111   : > { %871 = vmatpush.msra.mxu0 %v796_v22 }
 0x118   : > { %710 = vmatmul.f32.vlgmr.msrb.gmra.mxu0 %v530_v9 }
 0x185   : > { %v597_v33 = vpop.f32.mrf.mxu1 }
 0x18d   : > { %v536_v60 = vpop.f32.mrf.mxu0  ;;  %v635_v23 = vpop.f32.mrf.mxu2 }
 0x18e   : > { %v598_v34 = vadd.f32 %v597_v33, %v536_v60  ;;  %v740_v17 = vpop.f32.mrf.mxu1 }
 0x18f   : > { %v666_v39 = vpop.f32.mrf.mxu3 }
 0x190   : > { %v636_v26 = vadd.f32 %v635_v23, %v598_v34  ;;  %v951_v23 = vadd.s32 40, %v920_v50 }
 0x192   : > { %v667_v61 = vadd.f32 %v666_v39, %v636_v26  ;;  %v939_v26 = vadd.s32 24, %v920_v50 }
 0x195   : > { %v711_v63 = vpop.f32.mrf.mxu0 }
 0x196   : > { %v712_v40 = vadd.f32 %v711_v63, %v667_v61  ;;  %v963_v61 = vadd.s32 56, %v920_v50  ;;  %v945_v63 = vadd.s32 32, %v920_v50 }
 0x198   : > { %v741_v27 = vadd.f32 %v740_v17, %v712_v40  ;;  %v957_v40 = vadd.s32 48, %v920_v50 }
 0x19a   : > { %v743_v29 = vmax.f32 %v741_v27, 0.0 }
 0x19c   : > { %v747_v47 = vsel %vm745_vm10, %v743_v29, 0 }
 0x19d   : > { %v770_v45 = vand.u32 4294901760, %v747_v47 }
 0x19f   : > { %v771_v62 = vsub.f32 %v747_v47, %v770_v45  ;;  %801 = vmatmul.f32.vlgmr.msrb.gmra.mxu3 %v770_v45  ;;  %873 = vmatmul.f32.vlgmr.msra.gmra.mxu0 %v770_v45 }
 0x1a0   : > { %895 = vmatmul.f32.vlgmr.msra.gmra.mxu1 %v770_v45 }
 0x1a1   : > { %v772_v7 = vand.u32 4294901760, %v771_v62 }
 0x1a3   : > { %v773_v18 = vsub.f32 %v771_v62, %v772_v7 }
 0x1a5   : > { %v774_v16 = vand.u32 4294901760, %v773_v18 }
 0x1a7   : > { %775 = vmatmul.f32.vlgmr.msrb.gmra.mxu2 %v774_v16  ;;  %849 = vmatmul.f32.vlgmr.msra.gmra.mxu3 %v772_v7 }
 0x1af   : > { %825 = vmatmul.f32.vlgmr.msra.gmra.mxu2 %v771_v62 }
 0x21c   : > { %v874_v56 = vpop.f32.mrf.mxu0 }
 0x21d   : > { %v896_v12 = vpop.f32.mrf.mxu1 }
 0x222   : > { %v802_v41 = vpop.f32.mrf.mxu3 }
 0x22a   : > { %v776_v59 = vpop.f32.mrf.mxu2  ;;  %v850_v10 = vpop.f32.mrf.mxu3 }
 0x22b   : > { %v803_v15 = vadd.f32 %v802_v41, %v776_v59 }
 0x232   : > { %v826_v19 = vpop.f32.mrf.mxu2 }
 0x233   : > { %v827_v32 = vadd.f32 %v826_v19, %v803_v15 }
 0x235   : > { %v851_v25 = vadd.f32 %v850_v10, %v827_v32  ;;  %v2050_v32 = vld [vmem:[#allocation12_spill] sm:$0xff] }
 0x237   : > { %v875_v53 = vadd.f32 %v874_v56, %v851_v25 }
 0x239   : > { %v897_v9 = vadd.f32 %v896_v12, %v875_v53  ;;  %v2053_v53 = vld [vmem:[#allocation15_spill] sm:$0xff] }
 0x23b   : > { %v1195_v52 = vmul.f32 -1.442695, %v897_v9  ;;  %v2054_v9 = vld [vmem:[#allocation16_spill] sm:$0xff] }
 0x23d   : > { %1284 = vpow2.f32 %v1195_v52 }
 0x243   : > { %v1285_v3 = vpop.eup %1284 }
 0x244   : > { %v902_v49 = vadd.f32 1.0, %v1285_v3 }
 0x246   : > { %1286 = vrcp.f32 %v902_v49  ;;  %v914_v11 = vand.u32 2147483648, %v902_v49  ;;  %v912_v22 = vand.u32 2147483647, %v902_v49  ;;  %vm908_vm12 = vweird.f32 %v902_v49 }
 0x248   : > { %v915_v46 = vor.u32 1.1754944e-38, %v914_v11  ;;  %vm913_vm14 = vcmp.eq.f32.partialorder %v912_v22, 8.507059e+37 }
 0x24c   : > { %v1287_v48 = vpop.eup %1286 }
 0x24d   : > { %v904_v57 = vmul.f32 %v1287_v48, %v902_v49  ;;  %vm909_vm11 = vweird.f32 %v1287_v48  ;;  %v2055_v49 = vld [vmem:[#allocation17_spill] sm:$0xff] }
 0x24e   : > { %vm910_vm13 = vmor %vm908_vm12, %vm909_vm11 }
 0x24f   : > { %v905_v28 = vsub.f32 1.0, %v904_v57  ;;  %v2056_v57 = vld [vmem:[#allocation18_spill] sm:$0xff] }
 0x251   : > { %v906_v44 = vmul.f32 %v1287_v48, %v905_v28 }
 0x253   : > { %v907_v24 = vadd.f32 %v1287_v48, %v906_v44  ;;  %v2057_v44 = vld [vmem:[#allocation19_spill] sm:$0xff] }
 0x255   : > { %v911_v33 = vsel %vm910_vm13, %v1287_v48, %v907_v24  ;;  %v2058_v24 = vld [vmem:[#allocation20_spill] sm:$0xff] }
 0x256   : > { %v916_v60 = vsel %vm913_vm14, %v915_v46, %v911_v33 }
 0x257   : > { %v918_v34 = vperm.slane %v916_v60, 0  ;;  %v967_v39 = vperm.slane %v916_v60, 1  ;;  %v2059_v60 = vld [vmem:[#allocation21_spill] sm:$0xff] }
 0x259   : > { %935 = vperm.xlu1 %1269, %v918_v34   ;;  %929 = vperm.xlu0 %1268, %v918_v34  }
 0x25a   : > { %923 = vperm.xlu2 %1267, %v918_v34  }
 0x261   : > { %1272 = vset.pattern.permute.xlu1 %v951_v23  ;;  %1275 = vset.pattern.permute.xlu0 %v920_v50 }
 0x262   : > { %1270 = vset.pattern.permute.xlu2 %v939_v26 }
 0x269   : > { %953 = vperm.xlu1 %1272, %v918_v34   ;;  %972 = vperm.xlu0 %1275, %v967_v39  }
 0x26a   : > { %941 = vperm.xlu2 %1270, %v918_v34  }
 0x271   : > { %1274 = vset.pattern.permute.xlu1 %v963_v61  ;;  %1280 = vset.pattern.permute.xlu0 %v951_v23  ;;  %v2060_v23 = vld [vmem:[#allocation22_spill] sm:$0xff] }
 0x272   : > { %1271 = vset.pattern.permute.xlu2 %v945_v63 }
 0x279   : > { %965 = vperm.xlu1 %1274, %v918_v34   ;;  %1002 = vperm.xlu0 %1280, %v967_v39  }
 0x27a   : > { %947 = vperm.xlu2 %1271, %v918_v34  }
 0x281   : > { %1277 = vset.pattern.permute.xlu1 %v933_v51  ;;  %1283 = vset.pattern.permute.xlu0 %v963_v61 }
 0x282   : > { %1273 = vset.pattern.permute.xlu2 %v957_v40 }
 0x289   : > { %984 = vperm.xlu1 %1277, %v967_v39  }
 0x28a   : > { %959 = vperm.xlu2 %1273, %v918_v34  }
 0x291   : > { %1279 = vset.pattern.permute.xlu1 %v945_v63 }
 0x292   : > { %1276 = vset.pattern.permute.xlu2 %v927_v8 }
 0x299   : > { %996 = vperm.xlu1 %1279, %v967_v39  }
 0x29a   : > { %978 = vperm.xlu2 %1276, %v967_v39  }
 0x2a1   : > { %1282 = vset.pattern.permute.xlu1 %v963_v61 }
 0x2a2   : > { %1278 = vset.pattern.permute.xlu2 %v939_v26 }
 0x2a9   : > { %1014 = vperm.xlu1 %1282, %v967_v39  }
 0x2aa   : > { %990 = vperm.xlu2 %1278, %v967_v39  }
 0x2b2   : > { %1281 = vset.pattern.permute.xlu2 %v957_v40 }
 0x2b4   : > { %v924_v17 = vpop.permute.xlu2 %923 }
 0x2b5   : > { %v1016_v27 = vmul.f32 %v924_v17, %v1563_v5  ;;  %v1017_v29 = vmul.f32 %v924_v17, %v1566_v6 }
 0x2b7   : > { %1048 = vst [vmem:[%s1908_s23] sm:$0xff] %v1016_v27 }
 0x2b8   : > { %1049 = vst [vmem:[%s1908_s23 + $0x8] sm:$0xff] %v1017_v29 }
 0x2ba   : > { %1008 = vperm.xlu2 %1281, %v967_v39  }
 0x2c4   : > { %v942_v47 = vpop.permute.xlu2 %941 }
 0x2c5   : > { %v1022_v45 = vmul.f32 %v942_v47, %v1603_v20  ;;  %v1023_v5 = vmul.f32 %v942_v47, %v1606_v21 }
 0x2c7   : > { %1054 = vst [vmem:[%s1908_s23 + $0x30] sm:$0xff] %v1022_v45 }
 0x2c8   : > { %1055 = vst [vmem:[%s1908_s23 + $0x38] sm:$0xff] %v1023_v5 }
 0x2cb   : > { %v936_v6 = vpop.permute.xlu1 %935  ;;  %v930_v62 = vpop.permute.xlu0 %929 }
 0x2cc   : > { %v1020_v7 = vmul.f32 %v936_v6, %v1555_v2  ;;  %v1021_v18 = vmul.f32 %v936_v6, %v1560_v4  ;;  %v1018_v16 = vmul.f32 %v930_v62, %v1585_v13  ;;  %v1019_v41 = vmul.f32 %v930_v62, %v1588_v14 }
 0x2ce   : > { %1052 = vst [vmem:[%s1908_s23 + $0x20] sm:$0xff] %v1020_v7 }
 0x2cf   : > { %1053 = vst [vmem:[%s1908_s23 + $0x28] sm:$0xff] %v1021_v18 }
 0x2d0   : > { %1050 = vst [vmem:[%s1908_s23 + $0x10] sm:$0xff] %v1018_v16 }
 0x2d1   : > { %1051 = vst [vmem:[%s1908_s23 + $0x18] sm:$0xff] %v1019_v41 }
 0x2d4   : > { %v948_v20 = vpop.permute.xlu2 %947 }
 0x2d5   : > { %v1024_v21 = vmul.f32 %v948_v20, %v1627_v30  ;;  %v1025_v59 = vmul.f32 %v948_v20, %v1630_v31 }
 0x2d7   : > { %1056 = vst [vmem:[%s1908_s23 + $0x40] sm:$0xff] %v1024_v21 }
 0x2d8   : > { %1057 = vst [vmem:[%s1908_s23 + $0x48] sm:$0xff] %v1025_v59 }
 0x2db   : > { %v954_v2 = vpop.permute.xlu1 %953  ;;  %v973_v4 = vpop.permute.xlu0 %972 }
 0x2dc   : > { %v1026_v13 = vmul.f32 %v954_v2, %v1639_v35  ;;  %v1027_v14 = vmul.f32 %v954_v2, %v1642_v36  ;;  %v1032_v58 = vmul.f32 %v973_v4, %v1549_v0  ;;  %v1033_v50 = vmul.f32 %v973_v4, %v1552_v1 }
 0x2de   : > { %1058 = vst [vmem:[%s1908_s23 + $0x50] sm:$0xff] %v1026_v13 }
 0x2df   : > { %1059 = vst [vmem:[%s1908_s23 + $0x58] sm:$0xff] %v1027_v14 }
 0x2e0   : > { %1064 = vst [vmem:[%s1908_s23 + $0x80] sm:$0xff] %v1032_v58 }
 0x2e1   : > { %1065 = vst [vmem:[%s1908_s23 + $0x88] sm:$0xff] %v1033_v50 }
 0x2e4   : > { %v960_v30 = vpop.permute.xlu2 %959 }
 0x2e5   : > { %v1028_v31 = vmul.f32 %v960_v30, %v1657_v42  ;;  %v1029_v51 = vmul.f32 %v960_v30, %v1660_v43  ;;  %v2049_v43 = vld [vmem:[#allocation11_spill] sm:$0xff] }
 0x2e7   : > { %1060 = vst [vmem:[%s1908_s23 + $0x60] sm:$0xff] %v1028_v31 }
 0x2e8   : > { %1061 = vst [vmem:[%s1908_s23 + $0x68] sm:$0xff] %v1029_v51 }
 0x2eb   : > { %v966_v0 = vpop.permute.xlu1 %965  ;;  %v1003_v35 = vpop.permute.xlu0 %1002 }
 0x2ec   : > { %v1030_v1 = vmul.f32 %v966_v0, %v1687_v54  ;;  %v1031_v36 = vmul.f32 %v966_v0, %v1690_v55  ;;  %v1042_v8 = vmul.f32 %v1003_v35, %v1645_v37  ;;  %v1043_v15 = vmul.f32 %v1003_v35, %v1648_v38  ;;  %v2051_v37 = vld [vmem:[#allocation13_spill] sm:$0xff]  ;;  %v2052_v38 = vld [vmem:[#allocation14_spill] sm:$0xff] }
 0x2ee   : > { %1062 = vst [vmem:[%s1908_s23 + $0x70] sm:$0xff] %v1030_v1 }
 0x2ef   : > { %1063 = vst [vmem:[%s1908_s23 + $0x78] sm:$0xff] %v1031_v36 }
 0x2f0   : > { %1074 = vst [vmem:[%s1908_s23 + $0xd0] sm:$0xff] %v1042_v8 }
 0x2f1   : > { %1075 = vst [vmem:[%s1908_s23 + $0xd8] sm:$0xff] %v1043_v15 }
 0x2f4   : > { %v979_v42 = vpop.permute.xlu2 %978 }
 0x2f5   : > { %v1034_v19 = vmul.f32 %v979_v42, %v2049_v43  ;;  %v1035_v10 = vmul.f32 %v979_v42, %v2050_v32 }
 0x2f7   : > { %1066 = vst [vmem:[%s1908_s23 + $0x90] sm:$0xff] %v1034_v19 }
 0x2f8   : > { %1067 = vst [vmem:[%s1908_s23 + $0x98] sm:$0xff] %v1035_v10 }
 0x2fb   : > { %v985_v54 = vpop.permute.xlu1 %984 }
 0x2fc   : > { %v1036_v55 = vmul.f32 %v985_v54, %v2051_v37  ;;  %v1037_v25 = vmul.f32 %v985_v54, %v2052_v38 }
 0x2fe   : > { %1068 = vst [vmem:[%s1908_s23 + $0xa0] sm:$0xff] %v1036_v55 }
 0x2ff   : > { %1069 = vst [vmem:[%s1908_s23 + $0xa8] sm:$0xff] %v1037_v25 }
 0x304   : > { %v991_v56 = vpop.permute.xlu2 %990 }
 0x305   : > { %v1038_v12 = vmul.f32 %v991_v56, %v2053_v53  ;;  %v1039_v52 = vmul.f32 %v991_v56, %v2054_v9 }
 0x307   : > { %1070 = vst [vmem:[%s1908_s23 + $0xb0] sm:$0xff] %v1038_v12 }
 0x308   : > { %1071 = vst [vmem:[%s1908_s23 + $0xb8] sm:$0xff] %v1039_v52 }
 0x30b   : > { %v997_v3 = vpop.permute.xlu1 %996 }
 0x30c   : > { %v1040_v48 = vmul.f32 %v997_v3, %v2055_v49  ;;  %v1041_v28 = vmul.f32 %v997_v3, %v2056_v57 }
 0x30e   : > { %1072 = vst [vmem:[%s1908_s23 + $0xc0] sm:$0xff] %v1040_v48 }
 0x30f   : > { %1073 = vst [vmem:[%s1908_s23 + $0xc8] sm:$0xff] %v1041_v28 }
 0x314   : > { %v1009_v11 = vpop.permute.xlu2 %1008 }
 0x315   : > { %v1044_v22 = vmul.f32 %v1009_v11, %v2057_v44  ;;  %v1045_v46 = vmul.f32 %v1009_v11, %v2058_v24 }
 0x317   : > { %1076 = vst [vmem:[%s1908_s23 + $0xe0] sm:$0xff] %v1044_v22 }
 0x318   : > { %1077 = vst [vmem:[%s1908_s23 + $0xe8] sm:$0xff] %v1045_v46 }
 0x31b   : > { %v1015_v33 = vpop.permute.xlu1 %1014 }
 0x31c   : > { %v1046_v34 = vmul.f32 %v1015_v33, %v2059_v60  ;;  %v1047_v26 = vmul.f32 %v1015_v33, %v2060_v23 }
 0x31e   : > { %1078 = vst [vmem:[%s1908_s23 + $0xf0] sm:$0xff] %v1046_v34 }
 0x31f   : > { %1079 = vst [vmem:[%s1908_s23 + $0xf8] sm:$0xff] %v1047_v26 }
 0x320   : > { %1360 = shalt.err (!%p1357_p8)
}
 0x321   : > { %s1408_s0 = smov 256   ;;  %s1409_s29 = smov 16  }
 0x322   : > { %1212 = dma.vmem_to_hbm [thread:$0]  (%p1487_p11), %s1095_s6, 4096, %s1097_s10, %s1081_s19, %s1408_s0, %s1408_s0, %s1409_s29  }
 0x323 PF: > { %s1111_s13 = sand.u32 1, %s1391_s15   ;;  %p2061_p9 = scmp.ge.s32.totalorder %s1403_s18, 2 }
 0x324   : > { %s1112_s22 = scalar_lea.sflag [#allocation4], %s1111_s13 }
 0x325   : > { %p1223_p10 = pnand %p2061_p9, %p1491_p12 }
 0x327   : > { %p1224_p1 = pneg %p1223_p10 }
 0x329   : > { %1386 = dma.done.wait (%p1224_p1), %s1112_s22, 4096  }
 0x32a   : > { %1388 = vsyncadd (%p1224_p1), %s1112_s22, 4294963200  ;;  %p18_p2 = scmp.ge.s32.totalorder %s1460_s21, 4   ;;  %s2062_s15 = smov %s1395_s16 }
 0x32b   : > { %s2063_s16 = smov %s1399_s17  ;;  %s2064_s17 = smov %s1472_s24 }
 0x32c   : > { %s2065_s18 = smov %s1460_s21  ;;  %20 = sbr.rel (!%p18_p2) target bundleno = 8 (0x8), region = 86 }
 0x331   :  { %1118 = vsyncpa [#allocation3], 1 }
 0x332   :  { %1120 = vsyncpa [#allocation3 + $0x1], 1 }
 0x333   :  { %1121 = vsyncpa [#allocation4], 1 }
 0x334   :  { %1123 = vsyncpa [#allocation4 + $0x1], 1 }
 0x335   :  { %1124 = vsyncpa [#allocation5], 1 }
 0x336   :  { %1126 = vsyncpa [#allocation5 + $0x1], 1 }

</bundles_post_ra>
